<compile_context>
chip_gen: v7x
topology: tpu7x:2x2x1
jax: 0.10.0
libtpu: 0.0.40
codegen_flags: <defaults>
</compile_context>

<pallas_src>
import functools

import jax
import jax.numpy as jnp
from jax.experimental import pallas as pl
from jax.experimental.pallas import tpu as pltpu


def _round_up(n, m):
    return ((n + m - 1) // m) * m


def _cdiv(a, b):
    return -(-a // b)


def lin_tanh_kernel(x_ref, w_ref, b_ref, o_ref, *, out_cols, compute_dtype):
    # x_ref: (TM, F)  w_ref: (F, O_pad)  b_ref: (1, O_pad)  o_ref: (TM, O)
    x = x_ref[...]
    if compute_dtype is not None:
        x = x.astype(compute_dtype)  # in-VMEM VPU cast, hidden under the DMA
    acc = jnp.dot(x, w_ref[...], preferred_element_type=jnp.float32)
    # Keep only the real output columns before the (f32) bias + tanh epilogue;
    # the store is a (cheap) masked vst when out_cols < 128.
    acc = acc[:, :out_cols] + b_ref[...][:, :out_cols]
    o_ref[...] = jnp.tanh(acc).astype(o_ref.dtype)


def lin_tanh(x, w, b, *, block_m=1024, compute_dtype=None):
    """y = tanh(x @ w + b).

    x: (B, F); w: (F, O); b: (O,).  Returns (B, O) in x's dtype.
    compute_dtype: optionally jnp.bfloat16 to feed the MXU bf16 operands
    (f32 accumulate, f32 bias+tanh epilogue). The cast of x happens inside
    the kernel so it adds no extra HBM pass.
    """
    B, F = x.shape
    F_w, O = w.shape
    assert F_w == F, "weight shape mismatch"
    out_dtype = x.dtype

    # Pad the (tiny) weight/bias up to a 128-lane multiple: full MXU tile and
    # lane-dense f32 accumulator in VMEM. The real output stays (B, O).
    O_pad = _round_up(max(O, 1), 128)
    if O_pad != O:
        w = jnp.pad(w, ((0, 0), (0, O_pad - O)))
        b = jnp.pad(b, ((0, O_pad - O),))
    if compute_dtype is not None:
        w = w.astype(compute_dtype)  # tiny array; x is cast in-kernel
    b2 = b.reshape(1, O_pad).astype(jnp.float32)

    # Batch tile selection:
    #  * multiple of the sublane pack (8 for f32, 16 for bf16 operands)
    #  * as large as block_m to amortize per-step overhead
    #  * but keep >= 2 grid steps when B allows so v7x's 2 TCs both get work.
    eff_dtype = jnp.dtype(compute_dtype) if compute_dtype is not None else jnp.dtype(x.dtype)
    sub = 8 * max(1, 4 // max(1, eff_dtype.itemsize))  # 8 (f32) / 16 (bf16)
    tm = min(block_m, _round_up(B, sub))
    if B > sub:
        tm = min(tm, max(sub, _round_up(_cdiv(B, 2), sub)))
    grid_m = _cdiv(B, tm)

    # VMEM budget: double-buffered x + out tiles, resident weight/bias.
    vmem_need = (
        2 * tm * F * jnp.dtype(x.dtype).itemsize
        + 2 * tm * O * jnp.dtype(out_dtype).itemsize
        + F * O_pad * jnp.dtype(w.dtype).itemsize
        + O_pad * 4
    )
    cp_kwargs = dict(dimension_semantics=("parallel",))
    if vmem_need > 12 * 1024 * 1024:  # headroom vs v5e's 16 MiB scoped default
        cp_kwargs["vmem_limit_bytes"] = min(int(vmem_need * 2), 100 * 1024 * 1024)

    kernel = functools.partial(
        lin_tanh_kernel, out_cols=O, compute_dtype=compute_dtype
    )

    out = pl.pallas_call(
        kernel,
        out_shape=jax.ShapeDtypeStruct((B, O), out_dtype),
        grid=(grid_m,),
        in_specs=[
            pl.BlockSpec((tm, F), lambda i: (i, 0)),      # streamed activations
            pl.BlockSpec((F, O_pad), lambda i: (0, 0)),   # weight resident across grid
            pl.BlockSpec((1, O_pad), lambda i: (0, 0)),   # bias resident across grid
        ],
        out_specs=pl.BlockSpec((tm, O), lambda i: (i, 0)),
        compiler_params=pltpu.CompilerParams(**cp_kwargs),
    )(x, w, b2)

    return out


if __name__ == "__main__":
    featSize = 32
    outputSize = 1
    batch = 300  # not a multiple of the tile -> exercises the ragged last block

    key = jax.random.PRNGKey(0)
    kx, kw, kb = jax.random.split(key, 3)

    # Deterministic init mimicking nn.Linear default: U(-1/sqrt(F), 1/sqrt(F))
    bound = 1.0 / jnp.sqrt(jnp.float32(featSize))
    w = jax.random.uniform(kw, (featSize, outputSize), jnp.float32, -bound, bound)
    b = jax.random.uniform(kb, (outputSize,), jnp.float32, -bound, bound)
    x = jax.random.normal(kx, (batch, featSize), jnp.float32)

    ref = jnp.tanh(x @ w + b[None, :])

    # f32 path (matches the PyTorch module semantics)
    out = lin_tanh(x, w, b)
    jax.block_until_ready(out)
    assert out.shape == (batch, outputSize)
    assert jnp.allclose(out, ref, atol=1e-5), "f32 kernel mismatch vs reference"

    # bf16-operand path (v6e/v7x MXU option; cast done in-kernel), loose tol
    out_bf16 = lin_tanh(x, w, b, compute_dtype=jnp.bfloat16)
    jax.block_until_ready(out_bf16)
    assert jnp.allclose(out_bf16, ref, atol=5e-2), "bf16 kernel mismatch vs reference"

    print("KERNEL_OK")
</pallas_src>

<mosaic_0001>
module attributes {stable_mosaic.version = 11 : i64} {
  func.func @lin_tanh_kernel(%arg0: i32, %arg1: memref<152x32xf32, #tpu.memory_space<vmem>>, %arg2: memref<32x128xf32, #tpu.memory_space<vmem>>, %arg3: memref<1x128xf32, #tpu.memory_space<vmem>>, %arg4: memref<152x1xf32, #tpu.memory_space<vmem>>) attributes {dimension_semantics = [#tpu.dimension_semantics<parallel>], iteration_bounds = array<i64: 2>, scalar_prefetch = 0 : i64, scratch_operands = 0 : i64, tpu.core_type = #tpu.core_type<tc>, window_params = [{transform_indices = @transform_0, window_bounds = array<i64: 152, 32>}, {pipeline_mode = #tpu.pipeline_mode<synchronous>, transform_indices = @transform_1, window_bounds = array<i64: 32, 128>}, {pipeline_mode = #tpu.pipeline_mode<synchronous>, transform_indices = @transform_2, window_bounds = array<i64: 1, 128>}, {transform_indices = @transform_3, window_bounds = array<i64: 152, 1>}]} {
    %c0 = arith.constant 0 : index
    %c0_0 = arith.constant 0 : index
    %0 = vector.load %arg1[%c0, %c0_0] : memref<152x32xf32, #tpu.memory_space<vmem>>, vector<152x32xf32>
    %c0_1 = arith.constant 0 : index
    %c0_2 = arith.constant 0 : index
    %1 = vector.load %arg2[%c0_1, %c0_2] : memref<32x128xf32, #tpu.memory_space<vmem>>, vector<32x128xf32>
    %cst = arith.constant dense<0.000000e+00> : vector<152x128xf32>
    %2 = tpu.matmul %0, %1, %cst {dimension_numbers = #tpu.dot_dimension_numbers<[1], [0], [0], [1], [0, 0, 1, 1], [], []>} : vector<152x32xf32>, vector<32x128xf32>, vector<152x128xf32> -> vector<152x128xf32>
    %3 = vector.extract_strided_slice %2 {offsets = [0, 0], sizes = [152, 1], strides = [1, 1]} : vector<152x128xf32> to vector<152x1xf32>
    %c0_3 = arith.constant 0 : index
    %c0_4 = arith.constant 0 : index
    %4 = vector.load %arg3[%c0_3, %c0_4] : memref<1x128xf32, #tpu.memory_space<vmem>>, vector<1x128xf32>
    %5 = vector.extract_strided_slice %4 {offsets = [0, 0], sizes = [1, 1], strides = [1, 1]} : vector<1x128xf32> to vector<1x1xf32>
    %6 = vector.broadcast %5 : vector<1x1xf32> to vector<152x1xf32>
    %7 = arith.addf %3, %6 : vector<152x1xf32>
    %8 = math.tanh %7 : vector<152x1xf32>
    %c0_5 = arith.constant 0 : index
    %c0_6 = arith.constant 0 : index
    %9 = vector.load %arg4[%c0_5, %c0_6] : memref<152x1xf32, #tpu.memory_space<vmem>>, vector<152x1xf32>
    tpu.vector_store %arg4[%c0_5, %c0_6], %8 {strides = array<i32>} : memref<152x1xf32, #tpu.memory_space<vmem>>, vector<152x1xf32>,
    return
  }
  func.func @transform_0(%arg0: i32) -> (i32, i32) {
    %c0_i32 = arith.constant 0 : i32
    %c0_i32_0 = arith.constant 0 : i32
    return %arg0, %c0_i32 : i32, i32
  }
  func.func @transform_1(%arg0: i32) -> (i32, i32) {
    %c0_i32 = arith.constant 0 : i32
    %c0_i32_0 = arith.constant 0 : i32
    %c0_i32_1 = arith.constant 0 : i32
    return %c0_i32, %c0_i32_0 : i32, i32
  }
  func.func @transform_2(%arg0: i32) -> (i32, i32) {
    %c0_i32 = arith.constant 0 : i32
    %c0_i32_0 = arith.constant 0 : i32
    %c0_i32_1 = arith.constant 0 : i32
    return %c0_i32, %c0_i32_0 : i32, i32
  }
  func.func @transform_3(%arg0: i32) -> (i32, i32) {
    %c0_i32 = arith.constant 0 : i32
    %c0_i32_0 = arith.constant 0 : i32
    return %arg0, %c0_i32 : i32, i32
  }
}

</mosaic_0001>

<bundles_post_ra>
// kernel: tpu_custom_call.1
= control target key start
LH: loop header
LB: loop body
LE: loop exit
PB: predicated region body
PF: predicated region fallthrough
CT: control target
= control target key end

     0   :  { %s743_s12 = smov 0   ;;  %s921_s0 = inlined_call_operand.vmem [shape: f32[300,32], index: 0, kind: input, shape index: {}]   ;;  %s922_s1 = inlined_call_operand.vmem [shape: f32[32,128], index: 1, kind: input, shape index: {}]   ;;  %s923_s2 = inlined_call_operand.vmem [shape: f32[1,128], index: 2, kind: input, shape index: {}]   ;;  %s924_s3 = inlined_call_operand.vmem [shape: f32[300,1], index: 3, kind: output, shape index: {}]  }
   0x1 LB: > { %s536_s13 = sadd.s32 4294967295, %s718_s12   ;;  %p540_p0 = scmp.ge.s32.totalorder %s718_s12, 1  ;;  %s718_s12 = sphi %s743_s12, %s13_s12  }
   0x2   : > { %p138_p1 = scmp.lt.s32.totalorder %s718_s12, 3 }
   0x4   : > { %p139_p2 = pnand %p540_p0, %p138_p1 }
   0x5   : > { %v193_v0 = vld [vmem:[%s922_s1] sm:$0xff] (!%p139_p2)  ;;  %v194_v1 = vld [vmem:[%s922_s1 + $0x8] sm:$0xff] (!%p139_p2)  ;;  %v195_v2 = vld [vmem:[%s922_s1 + $0x10] sm:$0xff] (!%p139_p2)  ;;  %v720_v3 = vmov (!%p139_p2), 0.0|0.0   ;;  %s162_s22 = smul.u32 (!%p139_p2), 19, %s536_s13  ;;  %vm721_vm0 = vmmov (!%p139_p2), 0  }
   0x6   : > { %142 = sbr.rel (%p139_p2) target bundleno = 279 (0x117), region = 32  ;;  %653 = vmatprep.subr.bf16.mxu0 (!%p139_p2), %v720_v3  ;;  %v654_v4 = vpack.c.bf16 (!%p139_p2), %v194_v1, %v193_v0  ;;  %659 = vmatprep.subr.bf16.mxu1 (!%p139_p2), %v720_v3  ;;  %v196_v5 = vld [vmem:[%s922_s1 + $0x18] sm:$0xff] (!%p139_p2)  ;;  %v722_v6 = vmov (!%p139_p2), 0.0   ;;  %vm197_vm1 = vcmask (!%p139_p2), 261120   ;;  %v852_v27 = vld [vmem:[%s923_s2] ss:$0 sm:$0xff] (!%p139_p2) }
   0x7   : > { %596 = vmatprep.mubr.msk.f32.mxu0 (!%p139_p2), %vm721_vm0, %v722_v6  ;;  %626 = vmatprep.mubr.msk.f32.mxu1 (!%p139_p2), %vm721_vm0, %v722_v6  ;;  %v657_v7 = vpack.c.bf16 (!%p139_p2), %v196_v5, %v195_v2  ;;  %p163_p3 = scmp.lt.s32.totalorder (!%p139_p2), %s162_s22, 37  ;;  %vm460_vm2 = vcmask (!%p139_p2), 7168  }
   0x8   : > { %655 = vmatpush3.bf16.msra.mxu0 (!%p139_p2), %v654_v4  ;;  %661 = vmatpush3.bf16.msra.mxu1 (!%p139_p2), %v654_v4 }
   0x9   : > { %656 = vmatprep.subr.bf16.mxu0 (!%p139_p2), %v720_v3  ;;  %660 = vmatprep.subr.bf16.mxu1 (!%p139_p2), %v720_v3 }
   0xc   : > { %658 = vmatpush3.bf16.msra.mxu0 (!%p139_p2), %v657_v7  ;;  %662 = vmatpush3.bf16.msra.mxu1 (!%p139_p2), %v657_v7 }
   0xd   : > { %s926_s22 = smov (!%p163_p3, %s162_s22), 37 }
   0xe   : > { %s541_s23 = sshll.u32 %s926_s22, 3 }
   0xf   : > { %s775_s26 = scalar_lea.vmem %s921_s0, %s541_s23  ;;  %s865_s4 = scalar_lea.vmem %s924_s3, %s541_s23 }
  0x10   : > { %v174_v8 = vld [vmem:[%s775_s26] sm:$0xff]  ;;  %v184_v9 = vld [vmem:[%s775_s26 + $0x50] sm:$0xff]  ;;  %v175_v10 = vld [vmem:[%s775_s26 + $0x8] sm:$0xff] }
  0x11   : > { %597 = vmatmul.mubr.msk.f32.vlgmr.msra.gmra.mrb[0].mxu0 %vm197_vm1, %v174_v8  ;;  %627 = vmatmul.mubr.msk.f32.vlgmr.msra.gmra.mrb[0].mxu1 %vm197_vm1, %v184_v9  ;;  %v185_v11 = vld [vmem:[%s775_s26 + $0x58] sm:$0xff]  ;;  %v176_v12 = vld [vmem:[%s775_s26 + $0x10] sm:$0xff]  ;;  %v186_v13 = vld [vmem:[%s775_s26 + $0x60] sm:$0xff] }
  0x12   : > { %599 = vmatprep.mubr.msk.f32.mxu0 %vm721_vm0, %v722_v6  ;;  %629 = vmatprep.mubr.msk.f32.mxu1 %vm721_vm0, %v722_v6  ;;  %v177_v14 = vld [vmem:[%s775_s26 + $0x18] sm:$0xff]  ;;  %v187_v15 = vld [vmem:[%s775_s26 + $0x68] sm:$0xff]  ;;  %v178_v16 = vld [vmem:[%s775_s26 + $0x20] sm:$0xff] }
  0x13   : > { %v188_v17 = vld [vmem:[%s775_s26 + $0x70] sm:$0xff]  ;;  %v179_v18 = vld [vmem:[%s775_s26 + $0x28] sm:$0xff]  ;;  %v189_v19 = vld [vmem:[%s775_s26 + $0x78] sm:$0xff] }
  0x14   : > { %v180_v20 = vld [vmem:[%s775_s26 + $0x30] sm:$0xff]  ;;  %v190_v21 = vld [vmem:[%s775_s26 + $0x80] sm:$0xff]  ;;  %v181_v22 = vld [vmem:[%s775_s26 + $0x38] sm:$0xff] }
  0x15   : > { %600 = vmatmul.mubr.msk.f32.gmra.mrb[2].mxu0 %vm197_vm1, %v175_v10  ;;  %630 = vmatmul.mubr.msk.f32.gmra.mrb[2].mxu1 %vm197_vm1, %v185_v11  ;;  %v191_v23 = vld [vmem:[%s775_s26 + $0x88] sm:$0xff]  ;;  %v182_v24 = vld [vmem:[%s775_s26 + $0x40] sm:$0xff]  ;;  %v192_v25 = vld [vmem:[%s775_s26 + $0x90] sm:$0xff] }
  0x16   : > { %602 = vmatprep.mubr.msk.f32.mxu0 %vm721_vm0, %v722_v6  ;;  %632 = vmatprep.mubr.msk.f32.mxu1 %vm721_vm0, %v722_v6  ;;  %v183_v26 = vld [vmem:[%s775_s26 + $0x48] sm:$0xff] }
  0x19   : > { %603 = vmatmul.mubr.msk.f32.gmra.mrb[4].mxu0 %vm197_vm1, %v176_v12  ;;  %633 = vmatmul.mubr.msk.f32.gmra.mrb[4].mxu1 %vm197_vm1, %v186_v13 }
  0x1a   : > { %605 = vmatprep.mubr.msk.f32.mxu0 %vm721_vm0, %v722_v6  ;;  %635 = vmatprep.mubr.msk.f32.mxu1 %vm721_vm0, %v722_v6 }
  0x1d   : > { %606 = vmatmul.mubr.msk.f32.gmra.mrb[6].mxu0 %vm197_vm1, %v177_v14  ;;  %636 = vmatmul.mubr.msk.f32.gmra.mrb[6].mxu1 %vm197_vm1, %v187_v15 }
  0x1e   : > { %608 = vmatprep.mubr.msk.f32.mxu0 %vm721_vm0, %v722_v6  ;;  %638 = vmatprep.mubr.msk.f32.mxu1 %vm721_vm0, %v722_v6 }
  0x21   : > { %609 = vmatmul.mubr.msk.f32.gmra.mrb[8].mxu0 %vm197_vm1, %v178_v16  ;;  %639 = vmatmul.mubr.msk.f32.gmra.mrb[8].mxu1 %vm197_vm1, %v188_v17 }
  0x22   : > { %611 = vmatprep.mubr.msk.f32.mxu0 %vm721_vm0, %v722_v6  ;;  %641 = vmatprep.mubr.msk.f32.mxu1 %vm721_vm0, %v722_v6 }
  0x25   : > { %612 = vmatmul.mubr.msk.f32.gmra.mrb[10].mxu0 %vm197_vm1, %v179_v18  ;;  %642 = vmatmul.mubr.msk.f32.gmra.mrb[10].mxu1 %vm197_vm1, %v189_v19 }
  0x26   : > { %614 = vmatprep.mubr.msk.f32.mxu0 %vm721_vm0, %v722_v6  ;;  %644 = vmatprep.mubr.msk.f32.mxu1 %vm721_vm0, %v722_v6 }
  0x29   : > { %615 = vmatmul.mubr.msk.f32.gmra.mrb[12].mxu0 %vm197_vm1, %v180_v20  ;;  %645 = vmatmul.mubr.msk.f32.gmra.mrb[12].mxu1 %vm197_vm1, %v190_v21 }
  0x2a   : > { %617 = vmatprep.mubr.msk.f32.mxu0 %vm721_vm0, %v722_v6  ;;  %647 = vmatprep.mubr.msk.f32.mxu1 %vm721_vm0, %v722_v6 }
  0x2d   : > { %618 = vmatmul.mubr.msk.f32.gmra.mrb[14].mxu0 %vm197_vm1, %v181_v22  ;;  %648 = vmatmul.mubr.msk.f32.gmra.mrb[14].mxu1 %vm197_vm1, %v191_v23 }
  0x2e   : > { %620 = vmatprep.mubr.msk.f32.mxu0 %vm721_vm0, %v722_v6  ;;  %650 = vmatprep.mubr.msk.f32.mxu1 %vm721_vm0, %v722_v6 }
  0x31   : > { %621 = vmatmul.mubr.msk.f32.gmra.mrb[16].mxu0 %vm197_vm1, %v182_v24  ;;  %651 = vmatmul.mubr.msk.f32.gmra.mrb[16].mxu1 %vm197_vm1, %v192_v25 }
  0x32   : > { %623 = vmatprep.mubr.msk.f32.mxu0 %vm721_vm0, %v722_v6 }
  0x35   : > { %624 = vmatmul.mubr.msk.f32.gmra.mrb[18].mxu0 %vm197_vm1, %v183_v26 }
  0xe4   : > { %v321_v28 = vpop.f32.mrb[0].mxu0  ;;  %v371_v29 = vpop.f32.mrb[0].mxu1 }
  0xe5   : > { %v422_v30 = vadd.f32 %v852_v27, %v321_v28  ;;  %v598_v31 = vpop.f32.mrb[1].mxu0  ;;  %v432_v32 = vadd.f32 %v852_v27, %v371_v29  ;;  %v628_v33 = vpop.f32.mrb[1].mxu1 }
  0xe7   : > { %674 = vtanh.f32 %v422_v30 }
  0xe8   : > { %676 = vtanh.f32 %v432_v32  ;;  %v326_v34 = vpop.f32.mrb[2].mxu0  ;;  %v376_v35 = vpop.f32.mrb[2].mxu1 }
  0xe9   : > { %v423_v36 = vadd.f32 %v852_v27, %v326_v34  ;;  %v601_v37 = vpop.f32.mrb[3].mxu0  ;;  %v433_v38 = vadd.f32 %v852_v27, %v376_v35  ;;  %v631_v39 = vpop.f32.mrb[3].mxu1 }
  0xeb   : > { %678 = vtanh.f32 %v423_v36 }
  0xec   : > { %680 = vtanh.f32 %v433_v38  ;;  %v331_v40 = vpop.f32.mrb[4].mxu0  ;;  %v381_v41 = vpop.f32.mrb[4].mxu1 }
  0xed   : > { %v424_v42 = vadd.f32 %v852_v27, %v331_v40  ;;  %v604_v43 = vpop.f32.mrb[5].mxu0  ;;  %v434_v44 = vadd.f32 %v852_v27, %v381_v41  ;;  %v634_v45 = vpop.f32.mrb[5].mxu1 }
  0xef   : > { %682 = vtanh.f32 %v424_v42 }
  0xf0   : > { %684 = vtanh.f32 %v434_v44  ;;  %v336_v46 = vpop.f32.mrb[6].mxu0  ;;  %v386_v47 = vpop.f32.mrb[6].mxu1 }
  0xf1   : > { %v675_v48 = vpop.eup %674  ;;  %v425_v49 = vadd.f32 %v852_v27, %v336_v46  ;;  %v607_v50 = vpop.f32.mrb[7].mxu0  ;;  %v435_v51 = vadd.f32 %v852_v27, %v386_v47 }
  0xf2   : > { %v637_v52 = vpop.f32.mrb[7].mxu1  ;;  %v677_v53 = vpop.eup %676  ;;  %461 = vst.msk [vmem:[%s865_s4] sm:$0xff] %vm460_vm2, %v675_v48 }
  0xf3   : > { %471 = vst.msk [vmem:[%s865_s4 + $0x50] sm:$0xff] %vm460_vm2, %v677_v53  ;;  %686 = vtanh.f32 %v425_v49 }
  0xf4   : > { %688 = vtanh.f32 %v435_v51  ;;  %v341_v54 = vpop.f32.mrb[8].mxu0  ;;  %v391_v55 = vpop.f32.mrb[8].mxu1 }
  0xf5   : > { %v679_v56 = vpop.eup %678  ;;  %v426_v57 = vadd.f32 %v852_v27, %v341_v54  ;;  %v610_v58 = vpop.f32.mrb[9].mxu0  ;;  %v436_v59 = vadd.f32 %v852_v27, %v391_v55 }
  0xf6   : > { %v640_v60 = vpop.f32.mrb[9].mxu1  ;;  %v681_v61 = vpop.eup %680  ;;  %462 = vst.msk [vmem:[%s865_s4 + $0x8] sm:$0xff] %vm460_vm2, %v679_v56 }
  0xf7   : > { %472 = vst.msk [vmem:[%s865_s4 + $0x58] sm:$0xff] %vm460_vm2, %v681_v61  ;;  %690 = vtanh.f32 %v426_v57 }
  0xf8   : > { %692 = vtanh.f32 %v436_v59  ;;  %v346_v62 = vpop.f32.mrb[10].mxu0  ;;  %v396_v63 = vpop.f32.mrb[10].mxu1 }
  0xf9   : > { %v683_v0 = vpop.eup %682  ;;  %v427_v1 = vadd.f32 %v852_v27, %v346_v62  ;;  %v613_v2 = vpop.f32.mrb[11].mxu0  ;;  %v437_v3 = vadd.f32 %v852_v27, %v396_v63 }
  0xfa   : > { %v643_v4 = vpop.f32.mrb[11].mxu1  ;;  %v685_v5 = vpop.eup %684  ;;  %463 = vst.msk [vmem:[%s865_s4 + $0x10] sm:$0xff] %vm460_vm2, %v683_v0 }
  0xfb   : > { %473 = vst.msk [vmem:[%s865_s4 + $0x60] sm:$0xff] %vm460_vm2, %v685_v5  ;;  %694 = vtanh.f32 %v427_v1 }
  0xfc   : > { %696 = vtanh.f32 %v437_v3  ;;  %v351_v6 = vpop.f32.mrb[12].mxu0  ;;  %v401_v7 = vpop.f32.mrb[12].mxu1 }
  0xfd   : > { %v687_v8 = vpop.eup %686  ;;  %v428_v9 = vadd.f32 %v852_v27, %v351_v6  ;;  %v616_v10 = vpop.f32.mrb[13].mxu0  ;;  %v438_v11 = vadd.f32 %v852_v27, %v401_v7 }
  0xfe   : > { %v646_v12 = vpop.f32.mrb[13].mxu1  ;;  %v689_v13 = vpop.eup %688  ;;  %464 = vst.msk [vmem:[%s865_s4 + $0x18] sm:$0xff] %vm460_vm2, %v687_v8 }
  0xff   : > { %474 = vst.msk [vmem:[%s865_s4 + $0x68] sm:$0xff] %vm460_vm2, %v689_v13  ;;  %698 = vtanh.f32 %v428_v9 }
 0x100   : > { %700 = vtanh.f32 %v438_v11  ;;  %v356_v14 = vpop.f32.mrb[14].mxu0  ;;  %v406_v15 = vpop.f32.mrb[14].mxu1 }
 0x101   : > { %v691_v16 = vpop.eup %690  ;;  %v429_v17 = vadd.f32 %v852_v27, %v356_v14  ;;  %v619_v18 = vpop.f32.mrb[15].mxu0  ;;  %v439_v19 = vadd.f32 %v852_v27, %v406_v15 }
 0x102   : > { %v649_v20 = vpop.f32.mrb[15].mxu1  ;;  %v693_v21 = vpop.eup %692  ;;  %465 = vst.msk [vmem:[%s865_s4 + $0x20] sm:$0xff] %vm460_vm2, %v691_v16 }
 0x103   : > { %475 = vst.msk [vmem:[%s865_s4 + $0x70] sm:$0xff] %vm460_vm2, %v693_v21  ;;  %702 = vtanh.f32 %v429_v17 }
 0x104   : > { %704 = vtanh.f32 %v439_v19  ;;  %v361_v22 = vpop.f32.mrb[16].mxu0  ;;  %v411_v23 = vpop.f32.mrb[16].mxu1 }
 0x105   : > { %v695_v24 = vpop.eup %694  ;;  %v430_v25 = vadd.f32 %v852_v27, %v361_v22  ;;  %v622_v26 = vpop.f32.mrb[17].mxu0  ;;  %v440_v28 = vadd.f32 %v852_v27, %v411_v23 }
 0x106   : > { %v652_v29 = vpop.f32.mrb[17].mxu1  ;;  %v697_v30 = vpop.eup %696  ;;  %466 = vst.msk [vmem:[%s865_s4 + $0x28] sm:$0xff] %vm460_vm2, %v695_v24 }
 0x107   : > { %476 = vst.msk [vmem:[%s865_s4 + $0x78] sm:$0xff] %vm460_vm2, %v697_v30  ;;  %706 = vtanh.f32 %v430_v25 }
 0x108   : > { %708 = vtanh.f32 %v440_v28  ;;  %v366_v31 = vpop.f32.mrb[18].mxu0 }
 0x109   : > { %v699_v32 = vpop.eup %698  ;;  %v431_v33 = vadd.f32 %v852_v27, %v366_v31  ;;  %v625_v34 = vpop.f32.mrb[19].mxu0 }
 0x10a   : > { %v701_v35 = vpop.eup %700  ;;  %467 = vst.msk [vmem:[%s865_s4 + $0x30] sm:$0xff] %vm460_vm2, %v699_v32 }
 0x10b   : > { %477 = vst.msk [vmem:[%s865_s4 + $0x80] sm:$0xff] %vm460_vm2, %v701_v35  ;;  %710 = vtanh.f32 %v431_v33 }
 0x10d   : > { %v703_v36 = vpop.eup %702 }
 0x10e   : > { %v705_v37 = vpop.eup %704  ;;  %468 = vst.msk [vmem:[%s865_s4 + $0x38] sm:$0xff] %vm460_vm2, %v703_v36 }
 0x10f   : > { %478 = vst.msk [vmem:[%s865_s4 + $0x88] sm:$0xff] %vm460_vm2, %v705_v37 }
 0x111   : > { %v707_v38 = vpop.eup %706 }
 0x112   : > { %v709_v39 = vpop.eup %708  ;;  %469 = vst.msk [vmem:[%s865_s4 + $0x40] sm:$0xff] %vm460_vm2, %v707_v38 }
 0x113   : > { %479 = vst.msk [vmem:[%s865_s4 + $0x90] sm:$0xff] %vm460_vm2, %v709_v39 }
 0x115   : > { %v711_v27 = vpop.eup %710 }
 0x116   : > { %470 = vst.msk [vmem:[%s865_s4 + $0x48] sm:$0xff] %vm460_vm2, %v711_v27 }
 0x117 PF: > { %s13_s12 = sadd.s32 1, %s718_s12  }
 0x118   : > { %p10_p4 = scmp.ge.s32.totalorder %s13_s12, 4  }
 0x11a   :  { %12 = sbr.rel (!%p10_p4) target bundleno = 1 (0x1), region = 62 }

</bundles_post_ra>
